<compile_context>
chip_gen: v7x
topology: tpu7x:2x2x1
jax: 0.10.0
libtpu: 0.0.40
codegen_flags: <defaults>
</compile_context>

<pallas_src>
import functools
import math

import jax
import jax.numpy as jnp
from jax.experimental import pallas as pl
from jax.experimental.pallas import tpu as pltpu


def _round_up(n, m):
    return ((n + m - 1) // m) * m


def _attention_kernel(x_ref, w_ref, b_ref, o_ref, *, seq, dim, dim_p,
                      approx_recip, flatten_out):
    # x_ref: (block_b*S, D) compute dtype (rows already flattened by BlockSpec)
    # w_ref: (D, 3*Dp) fused, pre-scaled [Wq.T | Wk.T | Wv.T], zero-padded cols
    # b_ref: (1, 3*Dp) fused, pre-scaled [bq | bk | bv] in float32
    rows = x_ref.shape[0]
    bb = rows // seq

    x = x_ref[...]
    w = w_ref[...]
    b = b_ref[...]

    # Fused q/k/v projection: one MXU matmul, f32 accumulation, f32 bias.
    qkv = jnp.dot(x, w, preferred_element_type=jnp.float32) + b  # (rows, 3*Dp)

    cdt = x.dtype
    # Lane-aligned column slices (Dp is a 128 multiple); padded columns are 0.
    q = qkv[:, :dim_p].astype(cdt).reshape(bb, seq, dim_p)
    k = qkv[:, dim_p:2 * dim_p].astype(cdt).reshape(bb, seq, dim_p)
    v = qkv[:, 2 * dim_p:].astype(cdt).reshape(bb, seq, dim_p)

    # q @ k^T as a native NT contraction (no transpose materialized).  The
    # zero-padded columns of q and k contribute exactly nothing.
    s = jnp.einsum("bqd,bkd->bqk", q, k, preferred_element_type=jnp.float32)

    # Numerically stable softmax; normalization deferred to the output.
    m = jnp.max(s, axis=-1, keepdims=True)
    e = jnp.exp(s - m)
    denom = jnp.sum(e, axis=-1, keepdims=True)

    out = jnp.einsum("bqk,bkd->bqd", e.astype(cdt), v,
                     preferred_element_type=jnp.float32)         # (bb, S, Dp)
    out = out * pl.reciprocal(denom, approx=approx_recip)
    out = out[:, :, :dim]                                        # drop padding
    if flatten_out:
        # Lane-dense store: last dim S*D is a 128 multiple -> unmasked vst.
        out = out.reshape(bb, seq * dim)
    o_ref[...] = out.astype(o_ref.dtype)


def _vmem_bytes(bb, seq, dim, dim_p, cbytes, obytes):
    """Rough per-step live-VMEM estimate (double-buffered I/O blocks)."""
    rows = bb * seq
    return (2 * rows * dim * cbytes            # x block
            + 2 * bb * seq * dim * obytes      # out block
            + 2 * dim * 3 * dim_p * cbytes     # fused W (2x unless Buffered(1))
            + 2 * 3 * dim_p * 4                # fused bias
            + rows * 3 * dim_p * 4             # f32 qkv
            + rows * 3 * dim_p * cbytes        # q/k/v in compute dtype
            + 2 * bb * seq * seq * 4           # f32 scores + exp (dominant)
            + rows * dim_p * 4)                # f32 output accumulator


def _pick_block_b(B, seq, dim, dim_p, cbytes, obytes, vmem_budget,
                  rows_target=1024):
    best = 1
    for bb in range(1, B + 1):
        if B % bb:
            continue
        if B >= 2 and B // bb < 2:
            # Keep at least 2 grid steps so both v7x TensorCores get work.
            continue
        if bb * seq > max(rows_target, seq):
            continue
        if _vmem_bytes(bb, seq, dim, dim_p, cbytes, obytes) > vmem_budget:
            continue
        best = bb
    return best


def attention_pallas(x, wq, bq, wk, bk, wv, bv, *,
                     compute_dtype=jnp.bfloat16, out_dtype=None, block_b=None):
    """x: (B, S, D); w*: (D, D) torch layout W[out, in]; b*: (D,)."""
    B, S, D = x.shape
    cdtype = jnp.dtype(compute_dtype)
    odtype = jnp.dtype(x.dtype if out_dtype is None else out_dtype)
    approx_recip = cdtype != jnp.dtype(jnp.float32)

    # ---- one-time wrapper transforms -------------------------------------
    # Pre-transpose to W[in, out], fold the 1/sqrt(D) scale into the query
    # weights/bias, pad every segment to a 128-lane multiple, fuse into one
    # (D, 3*Dp) matrix.
    scale = 1.0 / math.sqrt(float(D))
    Dp = max(128, _round_up(D, 128))

    def _segment(w, b, s=1.0):
        wt = (w.T * s).astype(jnp.float32)
        bt = (b * s).astype(jnp.float32)
        if Dp != D:
            wt = jnp.pad(wt, ((0, 0), (0, Dp - D)))
            bt = jnp.pad(bt, (0, Dp - D))
        return wt, bt

    wq_t, bq_t = _segment(wq, bq, scale)
    wk_t, bk_t = _segment(wk, bk)
    wv_t, bv_t = _segment(wv, bv)
    w_fused = jnp.concatenate([wq_t, wk_t, wv_t], axis=1).astype(cdtype)
    b_fused = jnp.concatenate([bq_t, bk_t, bv_t]).reshape(1, 3 * Dp)

    # x delivered as (B*S, D): the BlockSpec hands the projection its operand
    # in exactly the shape it consumes (no in-kernel minor-dim reshape).
    x_rows = x.reshape(B * S, D).astype(cdtype)

    # ---- per-generation VMEM budget & block_b -----------------------------
    try:
        vmem_cap = int(pltpu.get_tpu_info().vmem_capacity_bytes)
    except Exception:
        vmem_cap = 64 * 1024 * 1024          # conservative: v7x per-core VMEM
    vmem_budget = max(16 << 20, min(vmem_cap // 3, 48 << 20))
    vmem_limit = int(min(vmem_cap * 3 // 4, 100 << 20))

    cbytes = cdtype.itemsize
    obytes = odtype.itemsize
    if block_b is None:
        block_b = _pick_block_b(B, S, D, Dp, cbytes, obytes, vmem_budget)
    block_b = max(1, min(int(block_b), B))
    while B % block_b:
        block_b -= 1
    # NOTE: for sequences where 2*block_b*S^2*4 exceeds the VMEM budget, a
    # flash-style KV-tiled grid axis (running max/sum scratch, pl.when
    # init/finalize) would replace the dense (S, S) score block.

    # Lane-dense output store only pays off (and only applies) when D itself
    # is not already a 128 multiple but S*D is.
    want_flat = (D % 128 != 0) and ((S * D) % 128 == 0)

    def _call(flatten_out, single_buffer_w):
        kernel = functools.partial(
            _attention_kernel, seq=S, dim=D, dim_p=Dp,
            approx_recip=approx_recip, flatten_out=flatten_out)
        const_kw = dict(pipeline_mode=pl.Buffered(1)) if single_buffer_w else {}
        in_specs = [
            pl.BlockSpec((block_b * S, D), lambda i: (i, 0)),          # x rows
            pl.BlockSpec((D, 3 * Dp), lambda i: (0, 0), **const_kw),   # fused W
            pl.BlockSpec((1, 3 * Dp), lambda i: (0, 0), **const_kw),   # fused b
        ]
        if flatten_out:
            out_shape = jax.ShapeDtypeStruct((B, S * D), odtype)
            out_spec = pl.BlockSpec((block_b, S * D), lambda i: (i, 0))
        else:
            out_shape = jax.ShapeDtypeStruct((B, S, D), odtype)
            out_spec = pl.BlockSpec((block_b, S, D), lambda i: (i, 0, 0))
        out = pl.pallas_call(
            kernel,
            out_shape=out_shape,
            grid_spec=pltpu.PrefetchScalarGridSpec(
                num_scalar_prefetch=0,
                grid=(B // block_b,),
                in_specs=in_specs,
                out_specs=out_spec,
            ),
            compiler_params=pltpu.CompilerParams(
                dimension_semantics=("parallel",),
                vmem_limit_bytes=vmem_limit),
        )(x_rows, w_fused, b_fused)
        return out.reshape(B, S, D) if flatten_out else out

    try:
        # Preferred: lane-dense output store + single-buffered constant W/b.
        return jax.block_until_ready(_call(want_flat, True))
    except Exception:
        # Fallback for builds that reject the minor-dim reshape or
        # pipeline_mode=pl.Buffered on pallas_call BlockSpecs.
        return _call(False, False)


def attention_ref(x, wq, bq, wk, bk, wv, bv):
    q = x @ wq.T + bq
    k = x @ wk.T + bk
    v = x @ wv.T + bv
    scores = jnp.einsum("bqd,bkd->bqk", q, k) / jnp.sqrt(
        jnp.float32(x.shape[-1]))
    attn = jax.nn.softmax(scores, axis=-1)
    return jnp.einsum("bqk,bkd->bqd", attn, v)


if __name__ == "__main__":
    B, S, D = 2, 8, 32  # batch, sequence, in_dim

    key = jax.random.PRNGKey(0)
    kx, kwq, kbq, kwk, kbk, kwv, kbv = jax.random.split(key, 7)

    x = jax.random.normal(kx, (B, S, D), dtype=jnp.float32)

    # Deterministic init mimicking nn.Linear's uniform(-1/sqrt(D), 1/sqrt(D)).
    bound = 1.0 / math.sqrt(D)
    wq = jax.random.uniform(kwq, (D, D), jnp.float32, -bound, bound)
    bq = jax.random.uniform(kbq, (D,), jnp.float32, -bound, bound)
    wk = jax.random.uniform(kwk, (D, D), jnp.float32, -bound, bound)
    bk = jax.random.uniform(kbk, (D,), jnp.float32, -bound, bound)
    wv = jax.random.uniform(kwv, (D, D), jnp.float32, -bound, bound)
    bv = jax.random.uniform(kbv, (D,), jnp.float32, -bound, bound)

    ref = attention_ref(x, wq, bq, wk, bk, wv, bv)

    # Default path: bf16 MXU operands, f32 accumulation / softmax statistics.
    out = attention_pallas(x, wq, bq, wk, bk, wv, bv)
    out = jax.block_until_ready(out)
    assert out.shape == (B, S, D)
    assert jnp.allclose(out, ref, atol=3e-2, rtol=3e-2), "bf16 path mismatch"

    # Full-f32 compute path (exact reciprocal) for a tighter numerical check.
    out_f32 = attention_pallas(x, wq, bq, wk, bk, wv, bv,
                               compute_dtype=jnp.float32)
    out_f32 = jax.block_until_ready(out_f32)
    assert jnp.allclose(out_f32, ref, atol=5e-3, rtol=5e-3), "f32 path mismatch"

    print("KERNEL_OK")
</pallas_src>

<mosaic_0001>
module attributes {stable_mosaic.version = 11 : i64} {
  func.func @_attention_kernel(%arg0: i32, %arg1: memref<8x32xbf16, #tpu.memory_space<vmem>>, %arg2: memref<32x384xbf16, #tpu.memory_space<vmem>>, %arg3: memref<1x384xf32, #tpu.memory_space<vmem>>, %arg4: memref<1x8x32xf32, #tpu.memory_space<vmem>>) attributes {dimension_semantics = [#tpu.dimension_semantics<parallel>], iteration_bounds = array<i64: 2>, scalar_prefetch = 0 : i64, scratch_operands = 0 : i64, tpu.core_type = #tpu.core_type<tc>, window_params = [{transform_indices = @transform_0, window_bounds = array<i64: 8, 32>}, {pipeline_mode = #tpu.pipeline_mode<synchronous>, transform_indices = @transform_1, window_bounds = array<i64: 32, 384>}, {pipeline_mode = #tpu.pipeline_mode<synchronous>, transform_indices = @transform_2, window_bounds = array<i64: 1, 384>}, {transform_indices = @transform_3, window_bounds = array<i64: 1, 8, 32>}]} {
    %c0 = arith.constant 0 : index
    %c0_0 = arith.constant 0 : index
    %0 = vector.load %arg1[%c0, %c0_0] : memref<8x32xbf16, #tpu.memory_space<vmem>>, vector<8x32xbf16>
    %c0_1 = arith.constant 0 : index
    %c0_2 = arith.constant 0 : index
    %1 = vector.load %arg2[%c0_1, %c0_2] : memref<32x384xbf16, #tpu.memory_space<vmem>>, vector<32x384xbf16>
    %c0_3 = arith.constant 0 : index
    %c0_4 = arith.constant 0 : index
    %2 = vector.load %arg3[%c0_3, %c0_4] : memref<1x384xf32, #tpu.memory_space<vmem>>, vector<1x384xf32>
    %cst = arith.constant dense<0.000000e+00> : vector<8x384xf32>
    %3 = tpu.matmul %0, %1, %cst {dimension_numbers = #tpu.dot_dimension_numbers<[1], [0], [0], [1], [0, 0, 1, 1], [], []>} : vector<8x32xbf16>, vector<32x384xbf16>, vector<8x384xf32> -> vector<8x384xf32>
    %4 = vector.broadcast %2 : vector<1x384xf32> to vector<8x384xf32>
    %5 = arith.addf %3, %4 : vector<8x384xf32>
    %6 = vector.extract_strided_slice %5 {offsets = [0, 0], sizes = [8, 128], strides = [1, 1]} : vector<8x384xf32> to vector<8x128xf32>
    %7 = arith.truncf %6 : vector<8x128xf32> to vector<8x128xbf16>
    %8 = vector.shape_cast %7 : vector<8x128xbf16> to vector<1x8x128xbf16>
    %9 = vector.extract_strided_slice %5 {offsets = [0, 128], sizes = [8, 128], strides = [1, 1]} : vector<8x384xf32> to vector<8x128xf32>
    %10 = arith.truncf %9 : vector<8x128xf32> to vector<8x128xbf16>
    %11 = vector.shape_cast %10 : vector<8x128xbf16> to vector<1x8x128xbf16>
    %12 = vector.extract_strided_slice %5 {offsets = [0, 256], sizes = [8, 128], strides = [1, 1]} : vector<8x384xf32> to vector<8x128xf32>
    %13 = arith.truncf %12 : vector<8x128xf32> to vector<8x128xbf16>
    %14 = vector.shape_cast %13 : vector<8x128xbf16> to vector<1x8x128xbf16>
    "tpu.trace_start"() <{level = 10 : i32, message = "bqd,bkd->bqk"}> : () -> ()
    %cst_5 = arith.constant dense<0.000000e+00> : vector<1x8x8xf32>
    %15 = tpu.matmul %8, %11, %cst_5 {dimension_numbers = #tpu.dot_dimension_numbers<[2], [2], [1], [1], [0, 0, 0, 1, 1, 1], [0], [0]>} : vector<1x8x128xbf16>, vector<1x8x128xbf16>, vector<1x8x8xf32> -> vector<1x8x8xf32>
    "tpu.trace_stop"() : () -> ()
    %cst_6 = arith.constant dense<0xFF800000> : vector<1x8xf32>
    %16 = vector.multi_reduction <maximumf>, %15, %cst_6 [2] : vector<1x8x8xf32> to vector<1x8xf32>
    %17 = vector.shape_cast %16 : vector<1x8xf32> to vector<1x8x1xf32>
    %18 = vector.broadcast %17 : vector<1x8x1xf32> to vector<1x8x8xf32>
    %19 = arith.subf %15, %18 : vector<1x8x8xf32>
    %20 = math.exp %19 : vector<1x8x8xf32>
    %cst_7 = arith.constant dense<0.000000e+00> : vector<1x8xf32>
    %21 = vector.multi_reduction <add>, %20, %cst_7 [2] : vector<1x8x8xf32> to vector<1x8xf32>
    %22 = vector.shape_cast %21 : vector<1x8xf32> to vector<1x8x1xf32>
    %23 = arith.truncf %20 : vector<1x8x8xf32> to vector<1x8x8xbf16>
    "tpu.trace_start"() <{level = 10 : i32, message = "bqk,bkd->bqd"}> : () -> ()
    %cst_8 = arith.constant dense<0.000000e+00> : vector<1x8x128xf32>
    %24 = tpu.matmul %23, %14, %cst_8 {dimension_numbers = #tpu.dot_dimension_numbers<[2], [1], [1], [2], [0, 0, 0, 1, 1, 2], [0], [0]>} : vector<1x8x8xbf16>, vector<1x8x128xbf16>, vector<1x8x128xf32> -> vector<1x8x128xf32>
    "tpu.trace_stop"() : () -> ()
    %25 = tpu.reciprocal %22 {approx = true} : vector<1x8x1xf32> -> vector<1x8x1xf32>
    %26 = vector.broadcast %25 : vector<1x8x1xf32> to vector<1x8x128xf32>
    %27 = arith.mulf %24, %26 : vector<1x8x128xf32>
    %28 = vector.extract_strided_slice %27 {offsets = [0, 0, 0], sizes = [1, 8, 32], strides = [1, 1, 1]} : vector<1x8x128xf32> to vector<1x8x32xf32>
    %c0_9 = arith.constant 0 : index
    %c0_10 = arith.constant 0 : index
    %c0_11 = arith.constant 0 : index
    %29 = vector.load %arg4[%c0_9, %c0_10, %c0_11] : memref<1x8x32xf32, #tpu.memory_space<vmem>>, vector<1x8x32xf32>
    tpu.vector_store %arg4[%c0_9, %c0_10, %c0_11], %28 {strides = array<i32>} : memref<1x8x32xf32, #tpu.memory_space<vmem>>, vector<1x8x32xf32>,
    return
  }
  func.func @transform_0(%arg0: i32) -> (i32, i32) {
    %c0_i32 = arith.constant 0 : i32
    %c0_i32_0 = arith.constant 0 : i32
    return %arg0, %c0_i32 : i32, i32
  }
  func.func @transform_1(%arg0: i32) -> (i32, i32) {
    %c0_i32 = arith.constant 0 : i32
    %c0_i32_0 = arith.constant 0 : i32
    %c0_i32_1 = arith.constant 0 : i32
    return %c0_i32, %c0_i32_0 : i32, i32
  }
  func.func @transform_2(%arg0: i32) -> (i32, i32) {
    %c0_i32 = arith.constant 0 : i32
    %c0_i32_0 = arith.constant 0 : i32
    %c0_i32_1 = arith.constant 0 : i32
    return %c0_i32, %c0_i32_0 : i32, i32
  }
  func.func @transform_3(%arg0: i32) -> (i32, i32, i32) {
    %c0_i32 = arith.constant 0 : i32
    %c0_i32_0 = arith.constant 0 : i32
    %c0_i32_1 = arith.constant 0 : i32
    return %arg0, %c0_i32, %c0_i32_0 : i32, i32, i32
  }
}

</mosaic_0001>

<bundles_post_ra>
// kernel: tpu_custom_call.1
= control target key start
LH: loop header
LB: loop body
LE: loop exit
PB: predicated region body
PF: predicated region fallthrough
CT: control target
= control target key end

     0   :  { %8 = vsyncpa [#allocation3], 0  ;;  %s1031_s0 = inlined_call_operand.hbm [shape: bf16[16,32], index: 0, kind: input, shape index: {}]   ;;  %s1032_s1 = inlined_call_operand.hbm [shape: bf16[32,384], index: 1, kind: input, shape index: {}]   ;;  %s1033_s2 = inlined_call_operand.vmem [shape: f32[1,384], index: 2, kind: input, shape index: {}]   ;;  %s1034_s3 = inlined_call_operand.hbm [shape: f32[2,8,32], index: 3, kind: output, shape index: {}]  }
   0x1   :  { %10 = vsyncpa [#allocation3 + $0x1], 0 }
   0x2   :  { %11 = vsyncpa [#allocation6], 0 }
   0x3   :  { %12 = vsyncpa [#allocation4], 0 }
   0x4   :  { %14 = vsyncpa [#allocation4 + $0x1], 0  ;;  %s825_s12 = smov 0   ;;  %s827_s13 = smov 0  }
   0x5   :  { %s829_s14 = smov 0   ;;  %s831_s15 = smov 0  }
   0x6 LB: > { %s846_s16 = sadd.s32 4294967295, %s795_s15   ;;  %s543_s17 = sadd.s32 4294967294, %s795_s15   ;;  %s795_s15 = sphi %s831_s15, %s1054_s15   ;;  %s791_s14 = sphi %s829_s14, %s1053_s14   ;;  %s787_s13 = sphi %s827_s13, %s1052_s13   ;;  %s783_s12 = sphi %s825_s12, %s1051_s12  }
   0x7   : > { %p40_p0 = scmp.ne.s32.totalorder %s787_s13, %s783_s12  ;;  %p1035_p1 = scmp.eq.s32.totalorder %s846_s16, 0 }
   0x8   : > { %p112_p3 = scmp.eq.s32.totalorder %s543_s17, 1  ;;  %p544_p5 = scmp.ge.s32.totalorder %s795_s15, 1 }
   0x9   : > { %p855_p4 = por %p1035_p1, %p40_p0  ;;  %p119_p7 = scmp.lt.s32.totalorder %s795_s15, 3 }
   0xa   : > { %p860_p6 = por %p112_p3, %p40_p0  ;;  %s797_s21 = smov [#allocation5]  }
   0xb   : > { %s1038_s18 = scalar_select %p855_p4, 1, 0 }
   0xc   : > { %s1039_s19 = scalar_select %p860_p6, 1, 0 }
   0xd   : > { %p865_p8 = pnand %p544_p5, %p119_p7  ;;  %s131_s22 = sshll.u32 %s797_s21, 4  ;;  %s869_s22 = int_to_ptr.vmem [resolvable:$true] %s131_s22 }
   0xe   : > { %s881_s24 = sadd.s32 1, %s795_s15   ;;  %s27_s25 = sadd.s32 1, %s791_s14 }
   0xf   : > { %s1040_s20 = scalar_select %p865_p8, 1, 0 }
  0x10   : > { %p601_p9 = pneg %p865_p8  ;;  %s24_s26 = ssub.s32 %s795_s15, %s881_s24 }
  0x11   : > { %s667_s29 = scalar_lea.hbm %s1032_s1, 768 }
  0x12   : > { %p876_p11 = pnand %p601_p9, %p1035_p1  ;;  %p668_p12 = scmp.ne.s32.totalorder %s1032_s1, %s667_s29 }
  0x13   : > { %p674_p5 = scmp.lt.u32.totalorder %s667_s29, %s1032_s1 }
  0x14   : > { %p669_p13 = pneg %p876_p11 }
  0x16   : > { %p670_p0 = pnand %p669_p13, %p668_p12 }
  0x18   : > { %p671_p3 = pneg %p670_p0 }
  0x1a   : > { %p676_p7 = pnand %p674_p5, %p671_p3 }
  0x1c   : > { %679 = shalt.err (!%p676_p7)
}
  0x1d   : > { %s680_s7 = scalar_lea.vmem %s869_s22, 768  ;;  %p688_p2 = scmp.lt.s32.totalorder %s869_s22, %s869_s22 }
  0x1e   : > { %p681_p9 = scmp.ne.s32.totalorder %s869_s22, %s680_s7  ;;  %p689_p6 = scmp.lt.s32.totalorder %s680_s7, %s680_s7 }
  0x20   : > { %p683_p10 = pnand %p681_p9, %p669_p13  ;;  %p690_p4 = por %p689_p6, %p688_p2 }
  0x22   : > { %p684_p1 = pneg %p683_p10 }
  0x24   : > { %p691_p8 = pnand %p690_p4, %p684_p1 }
  0x26   : > { %694 = shalt.err (!%p691_p8)
}
  0x27   : > { %s798_s8 = smov 192   ;;  %s799_s9 = smov 12  }
  0x28   : > { %604 = dma.hbm_to_vmem [thread:$0]  (!%p876_p11), %s1032_s1, 768, %s869_s22, [#allocation6], %s798_s8, %s798_s8, %s799_s9  }
  0x29   : > { %p25_p2 = scmp.eq.s32.totalorder %s24_s26, 0  ;;  %p34_p1 = scmp.ne.s32.totalorder %s791_s14, %s787_s13 }
  0x2a   : > { %p35_p4 = scmp.eq.s32.totalorder %s795_s15, 0  ;;  %p614_p6 = scmp.lt.s32.totalorder %s795_s15, 2 }
  0x2b   : > { %s912_s17 = scalar_select %p25_p2, %s791_s14, %s27_s25  }
  0x2c   : > { %p36_p8 = por %p35_p4, %p34_p1  ;;  %p1042_p10 = scmp.eq.s32.totalorder %s846_s16, 1 }
  0x2d   : > { %s148_s27 = sand.u32 1, %s791_s14   ;;  %s548_s28 = sshll.u32 %s795_s15, 6 }
  0x2e   : > { %p916_p12 = por %p1042_p10, %p34_p1  ;;  %s547_s29 = sshll.u32 %s148_s27, 2 }
  0x2f   : > { %s925_s4 = scalar_lea.hbm %s1031_s0, %s548_s28  ;;  %s152_s22 = scalar_lea.vmem [#allocation2], %s547_s29 }
  0x30   : > { %s159_s25 = sshll.u32 %s152_s22, 4  ;;  %p927_p11 = pnand %p614_p6, %p36_p8  ;;  %s931_s25 = int_to_ptr.vmem [resolvable:$true] %s159_s25 }
  0x31   : > { %s149_s5 = scalar_lea.sflag [#allocation3], %s148_s27  ;;  %s695_s6 = scalar_lea.hbm %s925_s4, 64 }
  0x32   : > { %p696_p13 = scmp.ne.s32.totalorder %s925_s4, %s695_s6  ;;  %p697_p0 = pneg %p927_p11 }
  0x33   : > { %s700_s9 = scalar_lea.hbm %s1031_s0, 128  ;;  %p701_p7 = scmp.lt.u32.totalorder %s925_s4, %s1031_s0 }
  0x34   : > { %p698_p3 = pnand %p697_p0, %p696_p13  ;;  %p702_p9 = scmp.lt.u32.totalorder %s700_s9, %s695_s6 }
  0x35   : > { %p704_p1 = scmp.lt.u32.totalorder %s695_s6, %s925_s4 }
  0x36   : > { %p699_p5 = pneg %p698_p3  ;;  %p703_p2 = por %p702_p9, %p701_p7 }
  0x38   : > { %p705_p4 = por %p704_p1, %p703_p2 }
  0x3a   : > { %p706_p6 = pnand %p705_p4, %p699_p5 }
  0x3c   : > { %709 = shalt.err (!%p706_p6)
}
  0x3d   : > { %s710_s27 = scalar_lea.vmem %s931_s25, 64  ;;  %s800_s28 = smov [#allocation2]  }
  0x3e   : > { %p711_p8 = scmp.ne.s32.totalorder %s931_s25, %s710_s27  ;;  %s715_s29 = sshll.u32 %s800_s28, 4  ;;  %s716_s29 = int_to_ptr.vmem [resolvable:$false] %s715_s29 }
  0x3f   : > { %s717_s23 = scalar_lea.vmem %s716_s29, 128  ;;  %p718_p3 = scmp.lt.s32.totalorder %s931_s25, %s716_s29 }
  0x40   : > { %p713_p10 = pnand %p711_p8, %p697_p0  ;;  %p719_p7 = scmp.lt.s32.totalorder %s717_s23, %s710_s27 }
  0x42   : > { %p714_p13 = pneg %p713_p10  ;;  %p720_p9 = por %p719_p7, %p718_p3 }
  0x44   : > { %p721_p2 = pnand %p720_p9, %p714_p13 }
  0x46   : > { %724 = shalt.err (!%p721_p2)
}
  0x47   : > { %608 = dma.hbm_to_vmem [thread:$0]  (!%p927_p11), %s925_s4, 64, %s931_s25, %s149_s5  }
  0x48   : > { %p1045_p5 = scmp.ne.s32.totalorder %s1040_s20, 0 }
  0x49   : > { %s961_s30 = sand.u32 (!%p1045_p5), 1, %s787_s13   ;;  %p1046_p0 = scmp.ne.s32.totalorder (!%p1045_p5), %s1038_s18, 0 }
  0x4a   : > { %168 = sbr.rel (%p1045_p5) target bundleno = 918 (0x396), region = 32  ;;  %s550_s22 = sshll.u32 (!%p1045_p5), %s961_s30, 2 }
  0x4b   : > { %s171_s6 = scalar_lea.sflag (!%p1045_p5), [#allocation3], %s961_s30  ;;  %s174_s7 = scalar_lea.vmem (!%p1045_p5), [#allocation2], %s550_s22 }
  0x51   : > { %770 = dma.done.wait (%p1046_p0), %s171_s6, 64  }
  0x52   : > { %772 = vsyncadd (%p1046_p0), %s171_s6, 4294967232  ;;  %p1047_p1 = scmp.eq.s32.totalorder %s846_s16, 0 }
  0x54   : > { %774 = dma.done.wait (%p1047_p1), [#allocation6], 768   ;;  %p1048_p11 = pmov %p1047_p1 }
  0x55   : > { %v801_v0 = vmov 0   ;;  %v655_v1 = vld [vmem:[#allocation5 + $0x4] ss:$12 sps:$4 sm:$0xff]   ;;  %v657_v2 = vld [vmem:[#allocation5] ss:$12 sps:$4 sm:$0xff]   ;;  %vm260_vm0 = vcmask 261120   ;;  %v213_v9 = vlaneseq }
  0x56   : > { %776 = vsyncadd (%p1048_p11), [#allocation6], 4294966528  ;;  %296 = vmatprep.mubr.bf16.mxu0 %v801_v0  ;;  %264 = vmatprep.subr.bf16.mxu0 %v655_v1  ;;  %v658_v3 = vld [vmem:[#allocation5 + $0x1c] ss:$12 sps:$4 sm:$0xff]   ;;  %v660_v4 = vld [vmem:[#allocation5 + $0x18] ss:$12 sps:$4 sm:$0xff]  }
  0x57   : > { %265 = vmatpush1.bf16.msra.mxu0 %v657_v2  ;;  %v202_v5 = vld [vmem:[%s174_s7] sm:$0xf]  ;;  %v802_v6 = vmov 0.0   ;;  %vm803_vm1 = vmmov 0   ;;  %v661_v7 = vld [vmem:[#allocation5 + $0x8] ss:$12 sps:$4 sm:$0xff]  }
  0x58   : > { %266 = vmatprep.subr.bf16.mxu0 %v658_v3  ;;  %573 = vmatprep.subr.bf16.mxu1 %v802_v6  ;;  %v662_v8 = vld [vmem:[#allocation5 + $0x20] ss:$12 sps:$4 sm:$0xff]   ;;  %v214_v10 = vshrl.u32 %v213_v9, 7  ;;  %v211_v12 = vld [vmem:[%s1033_s2] sm:$0x7]  ;;  %vm388_vm2 = vcmask 64512  }
  0x59   : > { %577 = vmatprep.mubr.msk.bf16.mxu1 %vm803_vm1, %v802_v6  ;;  %574 = vmatpush3.bf16.msra.mxu1 %v661_v7  ;;  %vm402_vm3 = vcmask 1043456   ;;  %s552_s4 = sshll.u32 %s961_s30, 3  ;;  %s563_s25 = sshll.u32 %s846_s16, 7 }
  0x5a   : > { %575 = vmatprep.subr.bf16.mxu1 %v802_v6  ;;  %v219_v11 = vsub.s32 1, %v214_v10  ;;  %v215_v14 = vsub.s32 0, %v214_v10  ;;  %v223_v29 = vsub.s32 2, %v214_v10  ;;  %s200_s26 = scalar_lea.vmem [#allocation7], %s552_s4  ;;  %s986_s10 = scalar_lea.hbm %s1034_s3, %s563_s25 }
  0x5b   : > { %267 = vmatpush1.bf16.msra.mxu0 %v660_v4  ;;  %s463_s5 = sshll.u32 %s200_s26, 4  ;;  %s450_s16 = scalar_lea.sflag [#allocation4], %s961_s30  ;;  %s988_s5 = int_to_ptr.vmem [resolvable:$true] %s463_s5 }
  0x5c   : > { %581 = vmatprep.subr.bf16.mxu0 %v802_v6  ;;  %v220_v13 = vrot.slane %v211_v12, %v219_v11  ;;  %v216_v19 = vrot.slane %v211_v12, %v215_v14  ;;  %v224_v32 = vrot.slane %v211_v12, %v223_v29  ;;  %s725_s11 = scalar_lea.vmem %s988_s5, 128  ;;  %s804_s27 = smov [#allocation7]  }
  0x5d   : > { %576 = vmatpush3.bf16.msra.mxu1 %v662_v8  ;;  %p726_p4 = scmp.ne.s32.totalorder %s988_s5, %s725_s11  ;;  %s729_s28 = sshll.u32 %s804_s27, 4  ;;  %s730_s28 = int_to_ptr.vmem [resolvable:$false] %s729_s28 }
  0x5e   : > { %559 = vmatmul.mubr.msk.bf16.vlgmr.msra.gmra.mrb[0].mxu0 %vm260_vm0, %v202_v5  ;;  %587 = vmatprep.subr.bf16.mxu1 %v802_v6  ;;  %s731_s29 = scalar_lea.vmem %s730_s28, 256  ;;  %p732_p10 = scmp.lt.s32.totalorder %s988_s5, %s730_s28 }
  0x5f   : > { %583 = vmatprep.mubr.msk.bf16.mxu0 %vm803_vm1, %v802_v6  ;;  %p727_p6 = pnand %p726_p4, %p916_p12  ;;  %p733_p13 = scmp.lt.s32.totalorder %s731_s29, %s725_s11 }
  0x60   : > { %578 = vmatmul.mubr.msk.bf16.vlgmr.msra.gmra.mrb[0].mxu1 %vm260_vm0, %v202_v5 }
  0x61   : > { %589 = vmatprep.mubr.msk.bf16.mxu1 %vm803_vm1, %v802_v6  ;;  %p728_p8 = pneg %p727_p6  ;;  %p734_p3 = por %p733_p13, %p732_p10 }
  0x63   : > { %p735_p7 = pnand %p734_p3, %p728_p8 }
 0x131   : > { %v298_v15 = vpop.f32.mrb[0].mxu0 }
 0x132   : > { %v300_v16 = vpop.f32.mrb[1].mxu0  ;;  %v299_v22 = vadd.f32 %v298_v15, %v216_v19 }
 0x133   : > { %v301_v17 = vadd.f32 %v300_v16, %v220_v13  ;;  %v302_v18 = vpop.f32.mrb[2].mxu0  ;;  %v339_v30 = vpop.f32.mrb[0].mxu1 }
 0x134   : > { %v303_v20 = vpop.f32.mrb[3].mxu0  ;;  %v345_v23 = vpack.c.bf16 %v299_v22, %v299_v22  ;;  %v579_v31 = vpop.f32.mrb[1].mxu1  ;;  %v340_v35 = vadd.f32 %v339_v30, %v224_v32 }
 0x135   : > { %v346_v21 = vpack.c.bf16 %v301_v17, %v301_v17  ;;  %v342_v33 = vpop.f32.mrb[2].mxu1 }
 0x136   : > { %v580_v34 = vpop.f32.mrb[3].mxu1  ;;  %v347_v36 = vpack.c.bf16 %v340_v35, %v340_v35 }
 0x137   : > { %582 = vmatpush3.bf16.xpose.msra.mxu0 %v346_v21 }
 0x138   : > { %v404_v37 = vsel %vm402_vm3, %v347_v36, 0 }
 0x139   : > { %588 = vmatpush3.bf16.msra.mxu1 %v404_v37 }
 0x13e   : > { %584 = vmatmul.mubr.bf16.vlgmr.msra.gmra.mrb[4].mxu0 %v345_v23 }
 0x211   : > { %v382_v24 = vpop.f32.mrb[4].mxu0 }
 0x212   : > { %v585_v25 = vpop.f32.mrb[5].mxu0  ;;  %v389_v26 = vsel %vm388_vm2, %v382_v24, -inf }
 0x213   : > { %390 = vmax.xlane.f32.xlu0 %v389_v26  ;;  %v385_v27 = vpop.f32.mrb[6].mxu0 }
 0x214   : > { %v586_v28 = vpop.f32.mrb[7].mxu0 }
 0x2a0   : > { %v391_v38 = vpop.xlane.xlu0 %390 }
 0x2a1   : > { %v392_v39 = vsub.f32 %v382_v24, %v391_v38 }
 0x2a3   : > { %v393_v40 = vmul.f32 1.442695, %v392_v39 }
 0x2a5   : > { %663 = vpow2.f32 %v393_v40 }
 0x2af   : > { %v664_v41 = vpop.eup %663 }
 0x2b0   : > { %v395_v42 = vsel %vm388_vm2, %v664_v41, 0.0  ;;  %v398_v43 = vpack.c.bf16 %v664_v41, %v664_v41 }
 0x2b1   : > { %396 = vadd.xlane.f32.xlu0 %v395_v42 }
 0x2b2   : > { %590 = vmatmul.mubr.msk.bf16.vlgmr.msra.gmra.mrb[4].mxu1 %vm388_vm2, %v398_v43 }
 0x33e   : > { %v397_v44 = vpop.xlane.xlu0 %396 }
 0x33f   : > { %665 = vrcp.f32 %v397_v44 }
 0x349   : > { %v666_v45 = vpop.eup %665 }
 0x385   : > { %v440_v46 = vpop.f32.mrb[4].mxu1 }
 0x386   : > { %v447_v47 = vmul.f32 %v666_v45, %v440_v46  ;;  %v591_v48 = vpop.f32.mrb[5].mxu1 }
 0x387   : > { %v443_v49 = vpop.f32.mrb[6].mxu1 }
 0x388   : > { %v592_v50 = vpop.f32.mrb[7].mxu1  ;;  %448 = vst.msk [vmem:[%s200_s26] sm:$0xff] %vm260_vm0, %v447_v47 }
 0x389   : > { %738 = shalt.err (!%p735_p7)
}
 0x38a   : > { %s739_s23 = scalar_lea.hbm %s986_s10, 128  ;;  %s743_s6 = scalar_lea.hbm %s1034_s3, 256 }
 0x38b   : > { %p740_p9 = scmp.ne.s32.totalorder %s986_s10, %s739_s23  ;;  %p744_p0 = scmp.lt.u32.totalorder %s986_s10, %s1034_s3 }
 0x38c   : > { %p745_p1 = scmp.lt.u32.totalorder %s743_s6, %s739_s23  ;;  %p747_p4 = scmp.lt.u32.totalorder %s739_s23, %s986_s10 }
 0x38d   : > { %p741_p2 = pnand %p740_p9, %p916_p12 }
 0x38e   : > { %p746_p11 = por %p745_p1, %p744_p0 }
 0x38f   : > { %p742_p5 = pneg %p741_p2 }
 0x390   : > { %p748_p6 = por %p747_p4, %p746_p11 }
 0x392   : > { %p749_p8 = pnand %p748_p6, %p742_p5 }
 0x394   : > { %752 = shalt.err (!%p749_p8)
}
 0x395   : > { %599 = dma.vmem_to_hbm [thread:$0]  (%p916_p12), %s988_s5, 128, %s986_s10, %s450_s16  }
 0x396 PF: > { %s475_s20 = sand.u32 1, %s783_s12   ;;  %p1049_p10 = scmp.ne.s32.totalorder %s1039_s19, 0 }
 0x397   : > { %p1050_p13 = scmp.ge.s32.totalorder %s795_s15, 2  ;;  %s476_s4 = scalar_lea.sflag [#allocation4], %s475_s20 }
 0x399   : > { %p610_p3 = pnand %p1050_p13, %p1049_p10 }
 0x39b   : > { %778 = dma.done.wait (!%p610_p3), %s476_s4, 128  }
 0x39c   : > { %780 = vsyncadd (!%p610_p3), %s476_s4, 4294967168  ;;  %p17_p7 = scmp.ge.s32.totalorder %s881_s24, 4   ;;  %s1051_s12 = smov %s787_s13 }
 0x39d   : > { %s1052_s13 = smov %s791_s14  ;;  %s1053_s14 = smov %s912_s17 }
 0x39e   : > { %s1054_s15 = smov %s881_s24  ;;  %19 = sbr.rel (!%p17_p7) target bundleno = 6 (0x6), region = 81 }
 0x3a5   :  { %481 = vsyncpa [#allocation3], 1 }
 0x3a6   :  { %483 = vsyncpa [#allocation3 + $0x1], 1 }
 0x3a7   :  { %484 = vsyncpa [#allocation6], 1 }
 0x3a8   :  { %485 = vsyncpa [#allocation4], 1 }
 0x3a9   :  { %487 = vsyncpa [#allocation4 + $0x1], 1 }

</bundles_post_ra>
